<compile_context>
chip_gen: v5e
topology: v5e:2x2
jax: 0.10.0
libtpu: 0.0.40
codegen_flags: <defaults>
</compile_context>

<pallas_src>
import math

import jax
import jax.numpy as jnp
from jax.experimental import pallas as pl
from jax.experimental.pallas import tpu as pltpu


# ---------------------------------------------------------------------------
# Pallas kernel: o[:, 0] = y * (1 - w) ; o[:, 1] = x * w   (fused concat)
# ---------------------------------------------------------------------------
def _weighted_concat_kernel(w_ref, y_ref, x_ref, o_ref):
    # w_ref : (1,) f32 in SMEM (scalar mixing weight, already sigmoid'ed)
    # y_ref : (bn, tc, ts) block of input_y
    # x_ref : (bn, tc, ts) block of input_x
    # o_ref : (bn, 2, tc, ts) block of the output viewed as (N, 2, C, S)
    w = w_ref[0]
    if o_ref.dtype == jnp.bfloat16:
        # bf16 VALU on v6e/v7x: keep tile math in bf16 (halves vreg pressure,
        # avoids a convert per element).  f32 inputs stay in f32.
        w = w.astype(jnp.bfloat16)
    o_ref[:, 0, :, :] = (y_ref[...] * (1 - w)).astype(o_ref.dtype)
    o_ref[:, 1, :, :] = (x_ref[...] * w).astype(o_ref.dtype)


# ---------------------------------------------------------------------------
# Block sizing
# ---------------------------------------------------------------------------
# Budget for one block set (x + y + out blocks of a single grid step).  The
# pipeline double-buffers every block, so the resident footprint is ~2x this,
# which stays inside the default scoped VMEM on v5e (16 MiB) and v6e/v7x
# (32 MiB), and well under v7x's 64 MiB physical VMEM per TensorCore.
_BLOCK_SET_BUDGET = 6 * 1024 * 1024


def _choose_blocks(n, c, s, itemsize):
    """Pick (bn, tc, ts): input blocks (bn, tc, ts), output block (bn, 2, tc, ts)."""
    sub = 8 if itemsize >= 4 else (16 if itemsize == 2 else 32)
    # x + y + 2*out elements per (bn, tc, ts) element -> 4 * itemsize bytes.
    max_elems = max(1, _BLOCK_SET_BUDGET // (4 * itemsize))

    if c * s <= max_elems:
        # Whole (C, S) slab per batch fits: fold batches so each grid step
        # moves a ~MiB-scale contiguous block instead of a few KB.
        bn, tc, ts = min(n, max(1, max_elems // (c * s))), c, s
    elif (max_elems // s) >= sub:
        # Channel tiling with full S: each input block is one fully
        # contiguous HBM range (better DMA efficiency than strided spatial
        # tiles); the output is two contiguous ranges.
        bn, ts = 1, s
        tc = min(c, (max_elems // s) // sub * sub)
    else:
        # S alone is too large: tile the spatial (lane) axis in multiples of
        # 128; the last tile may be partial (masked), never an oversized block.
        bn = 1
        if c * 128 <= max_elems:
            tc = c
        else:
            tc = max(sub, min(c, (max_elems // 128) // sub * sub))
        ts = max(128, min(s, (max_elems // tc) // 128 * 128))

    # v7x has 2 TensorCores: make sure big tensors expose >= 2 parallel
    # blocks so dimension_semantics=("parallel", ...) can shard across cores.
    grid_size = pl.cdiv(n, bn) * pl.cdiv(c, tc) * pl.cdiv(s, ts)
    if grid_size < 2 and 4 * n * c * s * itemsize >= (1 << 20):
        if bn > 1:
            bn = pl.cdiv(n, 2)
        elif ts == s and s >= 256:
            ts = max(128, ((s // 2) // 128) * 128)
        elif tc == c and c >= 2 * sub:
            tc = max(sub, ((c // 2) // sub) * sub)
    return bn, tc, ts


def _weighted_concat_tensor(w, input_x, input_y):
    """input_x/input_y: (N, C, *spatial) -> (N, 2C, *spatial)."""
    assert input_x.shape == input_y.shape, (input_x.shape, input_y.shape)
    assert input_x.ndim >= 2
    n, c = input_y.shape[0], input_y.shape[1]
    spatial = input_y.shape[2:]
    s = int(math.prod(spatial)) if spatial else 1
    dtype = input_y.dtype
    itemsize = jnp.dtype(dtype).itemsize

    x3 = input_x.reshape(n, c, s)
    y3 = input_y.reshape(n, c, s)
    w_arr = w.reshape(1).astype(jnp.float32)

    bn, tc, ts = _choose_blocks(n, c, s, itemsize)
    grid = (pl.cdiv(n, bn), pl.cdiv(c, tc), pl.cdiv(s, ts))

    elems = n * c * s
    cost = pl.CostEstimate(
        flops=2 * elems,                       # one multiply per element per half
        transcendentals=0,
        bytes_accessed=4 * elems * itemsize,   # read x, y; write 2C output
    )

    # Scoped VMEM sized from the actual blocks (x + y + out, double-buffered),
    # capped at 30 MiB so it is safe on every generation (v7x: 64 MiB phys).
    block_set_bytes = 4 * bn * tc * ts * itemsize
    vmem_limit = int(min(30 * 1024 * 1024,
                         max(16 * 1024 * 1024, 3 * block_set_bytes)))

    out = pl.pallas_call(
        _weighted_concat_kernel,
        # Output viewed as (N, 2, C, S): both half-stores are tile-aligned.
        out_shape=jax.ShapeDtypeStruct((n, 2, c, s), dtype),
        grid=grid,
        in_specs=[
            # scalar weight, whole (1,)-array resident in SMEM
            pl.BlockSpec(memory_space=pltpu.MemorySpace.SMEM),
            pl.BlockSpec((bn, tc, ts), lambda b, i, j: (b, i, j)),
            pl.BlockSpec((bn, tc, ts), lambda b, i, j: (b, i, j)),
        ],
        out_specs=pl.BlockSpec((bn, 2, tc, ts), lambda b, i, j: (b, 0, i, j)),
        compiler_params=pltpu.CompilerParams(
            dimension_semantics=("parallel", "parallel", "parallel"),
            vmem_limit_bytes=vmem_limit),
        cost_estimate=cost,
    )(w_arr, y3, x3)

    # (N, 2, C, S) -> (N, 2C, *spatial): contiguous reshape, free.
    return out.reshape((n, 2 * c) + spatial)


# ---------------------------------------------------------------------------
# WeightedConcat.forward
# ---------------------------------------------------------------------------
def weighted_concat_forward(coeff, input_x, input_y):
    """coeff: (1,) parameter.  Returns (combined, w) like the torch module."""
    w = jax.nn.sigmoid(coeff.astype(jnp.float32)).reshape(1)
    x_is_seq = isinstance(input_x, (list, tuple))
    y_is_seq = isinstance(input_y, (list, tuple))
    if x_is_seq and y_is_seq:
        # TODO(synk): for many tiny multi-scale entries, batch them into one
        # pallas_call via scalar-prefetched offsets to amortize launch cost.
        combined = [_weighted_concat_tensor(w, x, y)
                    for x, y in zip(input_x, input_y)]
    elif (not x_is_seq) and (not y_is_seq):
        combined = _weighted_concat_tensor(w, input_x, input_y)
    else:
        raise ValueError(
            "Expect two lists or two tensors, got {} and {}".format(
                type(input_x), type(input_y)))
    return combined, w


# ---------------------------------------------------------------------------
# Pure-JAX reference used to validate the Pallas path.
# ---------------------------------------------------------------------------
def _ref_forward(coeff, x, y):
    w = jax.nn.sigmoid(coeff.astype(jnp.float32)).reshape(1)
    return jnp.concatenate([y * (1.0 - w), x * w], axis=1), w


if __name__ == "__main__":
    batch, channels, spatial = 2, 4, 16

    key = jax.random.PRNGKey(0)
    kx, ky, kc = jax.random.split(key, 3)
    x = jax.random.normal(kx, (batch, channels, spatial, spatial), jnp.float32)
    y = jax.random.normal(ky, (batch, channels, spatial, spatial), jnp.float32)
    coeff = 0.5 * jax.random.normal(kc, (1,), jnp.float32)

    fwd = jax.jit(weighted_concat_forward)
    combined, w = fwd(coeff, x, y)
    combined = jax.block_until_ready(combined)
    w = jax.block_until_ready(w)

    assert combined.shape == (batch, 2 * channels, spatial, spatial), combined.shape
    assert w.shape == (1,), w.shape

    ref_combined, ref_w = _ref_forward(coeff, x, y)
    assert jnp.allclose(combined, ref_combined, rtol=1e-6, atol=1e-6), (
        float(jnp.max(jnp.abs(combined - ref_combined))))
    assert jnp.allclose(w, ref_w, rtol=1e-6, atol=1e-6)

    # Exercise the list-of-tensors path (different spatial sizes per entry).
    xs = [x, x[:, :, :8, :8]]
    ys = [y, y[:, :, :8, :8]]
    combined_list, w2 = weighted_concat_forward(coeff, xs, ys)
    combined_list = jax.block_until_ready(combined_list)
    for xi, yi, ci in zip(xs, ys, combined_list):
        ref_ci, _ = _ref_forward(coeff, xi, yi)
        assert ci.shape == (batch, 2 * channels) + xi.shape[2:]
        assert jnp.allclose(ci, ref_ci, rtol=1e-6, atol=1e-6)

    print("KERNEL_OK")
</pallas_src>

<mosaic_0001>
module attributes {stable_mosaic.version = 11 : i64} {
  func.func @_weighted_concat_kernel(%arg0: i32, %arg1: i32, %arg2: i32, %arg3: memref<1xf32, #tpu.memory_space<smem>>, %arg4: memref<2x4x256xf32, #tpu.memory_space<vmem>>, %arg5: memref<2x4x256xf32, #tpu.memory_space<vmem>>, %arg6: memref<2x2x4x256xf32, #tpu.memory_space<vmem>>) attributes {dimension_semantics = [#tpu.dimension_semantics<parallel>, #tpu.dimension_semantics<parallel>, #tpu.dimension_semantics<parallel>], iteration_bounds = array<i64: 1, 1, 1>, scalar_prefetch = 0 : i64, scratch_operands = 0 : i64, tpu.core_type = #tpu.core_type<tc>, window_params = [{transform_indices = @transform_0, window_bounds = array<i64: 1>}, {transform_indices = @transform_1, window_bounds = array<i64: 2, 4, 256>}, {transform_indices = @transform_2, window_bounds = array<i64: 2, 4, 256>}, {transform_indices = @transform_3, window_bounds = array<i64: 2, 2, 4, 256>}]} {
    %c0 = arith.constant 0 : index
    %0 = memref.load %arg3[%c0] : memref<1xf32, #tpu.memory_space<smem>>
    %c0_0 = arith.constant 0 : index
    %c0_1 = arith.constant 0 : index
    %c0_2 = arith.constant 0 : index
    %1 = vector.load %arg4[%c0_0, %c0_1, %c0_2] : memref<2x4x256xf32, #tpu.memory_space<vmem>>, vector<2x4x256xf32>
    %cst = arith.constant 1.000000e+00 : f32
    %2 = arith.subf %cst, %0 : f32
    %3 = vector.broadcast %2 : f32 to vector<2x4x256xf32>
    %4 = arith.mulf %1, %3 : vector<2x4x256xf32>
    %c0_3 = arith.constant 0 : index
    %c0_4 = arith.constant 0 : index
    %c0_5 = arith.constant 0 : index
    %c0_6 = arith.constant 0 : index
    %5 = vector.load %arg6[%c0_3, %c0_4, %c0_5, %c0_6] : memref<2x2x4x256xf32, #tpu.memory_space<vmem>>, vector<2x1x4x256xf32>
    %6 = vector.shape_cast %5 : vector<2x1x4x256xf32> to vector<2x4x256xf32>
    %7 = vector.shape_cast %4 : vector<2x4x256xf32> to vector<2x1x4x256xf32>
    tpu.vector_store %arg6[%c0_3, %c0_4, %c0_5, %c0_6], %7 {strides = array<i32>} : memref<2x2x4x256xf32, #tpu.memory_space<vmem>>, vector<2x1x4x256xf32>,
    %c0_7 = arith.constant 0 : index
    %c0_8 = arith.constant 0 : index
    %c0_9 = arith.constant 0 : index
    %8 = vector.load %arg5[%c0_7, %c0_8, %c0_9] : memref<2x4x256xf32, #tpu.memory_space<vmem>>, vector<2x4x256xf32>
    %9 = vector.broadcast %0 : f32 to vector<2x4x256xf32>
    %10 = arith.mulf %8, %9 : vector<2x4x256xf32>
    %c0_10 = arith.constant 0 : index
    %c1 = arith.constant 1 : index
    %c0_11 = arith.constant 0 : index
    %c0_12 = arith.constant 0 : index
    %11 = vector.load %arg6[%c0_10, %c1, %c0_11, %c0_12] : memref<2x2x4x256xf32, #tpu.memory_space<vmem>>, vector<2x1x4x256xf32>
    %12 = vector.shape_cast %11 : vector<2x1x4x256xf32> to vector<2x4x256xf32>
    %13 = vector.shape_cast %10 : vector<2x4x256xf32> to vector<2x1x4x256xf32>
    tpu.vector_store %arg6[%c0_10, %c1, %c0_11, %c0_12], %13 {strides = array<i32>} : memref<2x2x4x256xf32, #tpu.memory_space<vmem>>, vector<2x1x4x256xf32>,
    return
  }
  func.func @transform_0(%arg0: i32, %arg1: i32, %arg2: i32) -> i32 {
    %c0_i32 = arith.constant 0 : i32
    %c0_i32_0 = arith.constant 0 : i32
    return %c0_i32 : i32
  }
  func.func @transform_1(%arg0: i32, %arg1: i32, %arg2: i32) -> (i32, i32, i32) {
    %c0_i32 = arith.constant 0 : i32
    return %arg0, %arg1, %arg2 : i32, i32, i32
  }
  func.func @transform_2(%arg0: i32, %arg1: i32, %arg2: i32) -> (i32, i32, i32) {
    %c0_i32 = arith.constant 0 : i32
    return %arg0, %arg1, %arg2 : i32, i32, i32
  }
  func.func @transform_3(%arg0: i32, %arg1: i32, %arg2: i32) -> (i32, i32, i32, i32) {
    %c0_i32 = arith.constant 0 : i32
    %c0_i32_0 = arith.constant 0 : i32
    return %arg0, %c0_i32, %arg1, %arg2 : i32, i32, i32, i32
  }
}

</mosaic_0001>

<bundles_post_ra>
// kernel: weighted_concat_forward.1
= control target key start
LH: loop header
LB: loop body
LE: loop exit
PB: predicated region body
PF: predicated region fallthrough
CT: control target
= control target key end

     0   :  { %s88_s0 = inlined_call_operand.<no memory space> [shape: f32[1], index: 0, kind: input, shape index: {}]   ;;  %s89_s1 = inlined_call_operand.vmem [shape: f32[2,4,256], index: 1, kind: input, shape index: {}]   ;;  %s90_s2 = inlined_call_operand.vmem [shape: f32[2,4,256], index: 2, kind: input, shape index: {}]   ;;  %s91_s3 = inlined_call_operand.vmem [shape: f32[2,2,4,256], index: 3, kind: output, shape index: {}]  }
   0x1   :  { %v16_v0 = vld [vmem:[%s89_s1] sm:$0xff]  ;;  %s18_s16 = ssub.f32 1.0, %s88_s0  ;;  %v17_v1 = vld [vmem:[%s89_s1 + $0x8] sm:$0xff]  ;;  %v26_v3 = vstv %s88_s0 }
   0x2   :  { %v24_v2 = vld [vmem:[%s90_s2] sm:$0xff]  ;;  %v25_v5 = vld [vmem:[%s90_s2 + $0x8] sm:$0xff] }
   0x3   :  { %v27_v4 = vmul.f32 %v26_v3, %v24_v2  ;;  %v19_v6 = vstv %s18_s16  ;;  %v28_v7 = vmul.f32 %v26_v3, %v25_v5 }
   0x4   :  { %v20_v8 = vmul.f32 %v19_v6, %v16_v0  ;;  %v21_v9 = vmul.f32 %v19_v6, %v17_v1 }
   0x5   :  { %36 = vst [vmem:[%s91_s3 + $0x8] sm:$0xff] %v27_v4 }
   0x6   :  { %37 = vst [vmem:[%s91_s3 + $0x18] sm:$0xff] %v28_v7 }
   0x7   :  { %22 = vst [vmem:[%s91_s3] sm:$0xff] %v20_v8 }
   0x8   :  { %23 = vst [vmem:[%s91_s3 + $0x10] sm:$0xff] %v21_v9 }

</bundles_post_ra>
